<compile_context>
chip_gen: v5e
topology: v5e:2x2
jax: 0.10.0
libtpu: 0.0.40
codegen_flags: <defaults>
</compile_context>

<pallas_src>
import functools

import jax
import jax.numpy as jnp
import numpy as np
from jax import lax
from jax.experimental import pallas as pl
from jax.experimental.pallas import tpu as pltpu

BN_EPS = 1e-5


def fold_bn(gamma, beta, mean, var):
    scale = gamma / jnp.sqrt(var + BN_EPS)
    shift = beta - mean * scale
    return scale, shift


def _lane_shift(v, delta, n):
    """result[:, l] = v[:, (l + delta) % n] (static delta).

    Wrapped lanes carry garbage; the caller masks them to zero.  Implemented
    with static lane slices + concat (lowers to an XLU lane rotate)."""
    d = delta % n
    if d == 0:
        return v
    return jnp.concatenate([v[:, d:], v[:, :d]], axis=1)


# -----------------------------------------------------------------------------
# Fused Pallas kernel: conv1 + tp_conv + conv2 (each with folded BN + ReLU)
# -----------------------------------------------------------------------------
def decoder_kernel(x_ref, w1_ref, b1_ref, wt_ref, b2_ref, w2_ref, b3_ref,
                   mask_ref, o_ref, *, H, W, n_parity, shift_meta):
    """One batch group per grid step.

    x_ref:    (1, R_in, H*W)        rows = (batch-in-group, Cin)
    w1_ref:   (R_mid, R_in)         1x1 conv1 (BN1 scale folded, block-diag over batch)
    b1_ref:   (R_mid, 1)            BN1 shift
    wt_ref:   (k*k, R_mid, R_mid)   per-tap channel mixers (BNt scale folded)
    b2_ref:   (R_mid, 1)            BNt shift
    w2_ref:   (R_out, R_mid)        1x1 conv2 (BN2 scale folded)
    b3_ref:   (R_out, 1)            BN2 shift
    mask_ref: (n_shift, 1, H*W)     0/1 border masks, one per distinct lane shift
    o_ref:    (1, R_out, s*s*H*W)   output, parity-blocked on the lane axis
    shift_meta: static tuple of (dh, dw, ((tap_index, parity_index), ...))
    """
    HW = H * W
    R_mid = w1_ref.shape[0]
    f32 = jnp.float32

    # ---- stage 1: 1x1 conv + BN + ReLU (one lane-dense matmul) --------------
    y1 = jnp.dot(w1_ref[...], x_ref[0], preferred_element_type=f32)
    y1 = jnp.maximum(y1 + b1_ref[...], 0.0)                    # (R_mid, HW)

    # ---- stage 2: ConvTranspose2d + BN + ReLU by output parity --------------
    # One shifted+masked copy of y1 per distinct shift; per tap a small
    # (R_mid, R_mid) matmul accumulated into the tap's parity slab.
    acc = [None] * n_parity
    for si, (dh, dw, taps) in enumerate(shift_meta):
        if dh == 0 and dw == 0:
            shifted = y1
        else:
            shifted = _lane_shift(y1, dh * W + dw, HW) * mask_ref[si]
        for (t, a) in taps:
            c = jnp.dot(wt_ref[t], shifted, preferred_element_type=f32)
            acc[a] = c if acc[a] is None else acc[a] + c
    slabs = [s_ if s_ is not None else jnp.zeros((R_mid, HW), f32) for s_ in acc]

    y2 = jnp.concatenate(slabs, axis=1)                        # (R_mid, n_parity*HW)
    y2 = jnp.maximum(y2 + b2_ref[...], 0.0)

    # ---- stage 3: 1x1 conv + BN + ReLU, single lane-dense store -------------
    y3 = jnp.dot(w2_ref[...], y2, preferred_element_type=f32)
    o_ref[0] = jnp.maximum(y3 + b3_ref[...], 0.0).astype(o_ref.dtype)


# -----------------------------------------------------------------------------
# Decoder forward (Pallas) — NCHW in, NCHW out
# -----------------------------------------------------------------------------
def decoder_forward(params, x_nchw, k, s, p, op):
    B, Cin, H, W = x_nchw.shape
    mid = params["w1"].shape[0]
    Cout = params["w2"].shape[0]
    f32 = jnp.float32

    Hout = (H - 1) * s - 2 * p + k + op
    Wout = (W - 1) * s - 2 * p + k + op
    assert 0 <= op < s, "requires output_padding < stride"
    assert k - 1 - p >= 0, "requires padding <= kernel_size - 1"
    # TODO(synk): pad the working grid if k + op > 2*p + s (not a LinkNet config)
    assert Hout <= s * H and Wout <= s * W

    # batch grouping: 2 parallel grid steps when possible (v7x dual TC);
    # batches inside a group ride on the sublane axis via block-diag weights.
    G = 2 if (B >= 2 and B % 2 == 0) else 1
    Bg = B // G
    rup8 = lambda n: -(-n // 8) * 8
    R_in, R_mid, R_out = rup8(Bg * Cin), rup8(Bg * mid), rup8(Bg * Cout)

    s1, b1 = fold_bn(*params["bn1"])
    s2, b2 = fold_bn(*params["bnt"])
    s3, b3 = fold_bn(*params["bn2"])

    def kron_pad(mat, rows, cols):
        m = jnp.kron(jnp.eye(Bg, dtype=f32), mat.astype(f32))
        return jnp.pad(m, ((0, rows - m.shape[0]), (0, cols - m.shape[1])))

    def tile_pad(vec, rows):
        v = jnp.tile(vec.astype(f32), Bg)
        return jnp.pad(v, (0, rows - v.shape[0])).reshape(rows, 1)

    # BN scales folded into the weight rows; shifts stay as (rows, 1) vectors.
    w1g = kron_pad(s1[:, None] * params["w1"].reshape(mid, Cin), R_mid, R_in)
    w2g = kron_pad(s3[:, None] * params["w2"].reshape(Cout, mid), R_out, R_mid)
    b1g, b2g, b3g = tile_pad(b1, R_mid), tile_pad(b2, R_mid), tile_pad(b3, R_out)

    # Per-tap channel mixers M[co, ci] = s2[co] * Wt[ci, co, kh, kw] and the
    # static parity-decomposition schedule:
    #   out[s*qh + ah, s*qw + aw] += M_{kh,kw} @ y1[qh + dh, qw + dw]
    # with ah = (kh - p) mod s, dh = (ah + p - kh) / s  (same for w).
    wt = params["wt"].astype(f32)                               # (ci, co, kh, kw)
    mixers, groups = [], {}
    for kh in range(k):
        for kw in range(k):
            t = kh * k + kw
            ah, aw = (kh - p) % s, (kw - p) % s
            dh, dw = (ah + p - kh) // s, (aw + p - kw) // s
            groups.setdefault((dh, dw), []).append((t, ah * s + aw))
            mixers.append(kron_pad(s2[:, None] * wt[:, :, kh, kw].T, R_mid, R_mid))
    wtg = jnp.stack(mixers)                                     # (k*k, R_mid, R_mid)

    shift_meta = []
    masks_np = np.zeros((len(groups), 1, H * W), np.float32)
    for si, ((dh, dw), taps) in enumerate(sorted(groups.items())):
        shift_meta.append((dh, dw, tuple(taps)))
        for qh in range(H):
            if 0 <= qh + dh < H:
                for qw in range(W):
                    if 0 <= qw + dw < W:
                        masks_np[si, 0, qh * W + qw] = 1.0
    masks = jnp.asarray(masks_np)
    n_shifts = len(shift_meta)

    xg = x_nchw.astype(f32).reshape(G, Bg * Cin, H * W)
    if R_in > Bg * Cin:
        xg = jnp.pad(xg, ((0, 0), (0, R_in - Bg * Cin), (0, 0)))

    kernel = functools.partial(decoder_kernel, H=H, W=W, n_parity=s * s,
                               shift_meta=tuple(shift_meta))
    c2 = lambda g: (0, 0)
    c3 = lambda g: (0, 0, 0)

    out = pl.pallas_call(
        kernel,
        out_shape=jax.ShapeDtypeStruct((G, R_out, s * s * H * W), f32),
        grid=(G,),
        in_specs=[
            pl.BlockSpec((1, R_in, H * W), lambda g: (g, 0, 0)),    # x (per group)
            pl.BlockSpec((R_mid, R_in), c2),                        # w1 (folded)
            pl.BlockSpec((R_mid, 1), c2),                           # b1
            pl.BlockSpec((k * k, R_mid, R_mid), c3),                # per-tap mixers
            pl.BlockSpec((R_mid, 1), c2),                           # b2
            pl.BlockSpec((R_out, R_mid), c2),                       # w2 (folded)
            pl.BlockSpec((R_out, 1), c2),                           # b3
            pl.BlockSpec((n_shifts, 1, H * W), c3),                 # border masks
        ],
        out_specs=pl.BlockSpec((1, R_out, s * s * H * W), lambda g: (g, 0, 0)),
        compiler_params=pltpu.CompilerParams(
            dimension_semantics=("parallel",),          # batch groups -> both TCs on v7x
            vmem_limit_bytes=32 * 1024 * 1024),
    )(xg, w1g, b1g, wtg, b2g, w2g, b3g, masks)

    # Layout plumbing only: strip row padding, interleave parity blocks -> NCHW.
    out = out[:, :Bg * Cout, :].reshape(G, Bg, Cout, s, s, H, W)
    out = jnp.transpose(out, (0, 1, 2, 5, 3, 6, 4))              # (..., qh, ah, qw, aw)
    out = out.reshape(B, Cout, s * H, s * W)[:, :, :Hout, :Wout]
    return out


# -----------------------------------------------------------------------------
# Pure-JAX reference (lax convs, full f32 precision) for correctness check
# -----------------------------------------------------------------------------
def decoder_reference(params, x_nchw, k, s, p, op):
    dn = ("NHWC", "HWIO", "NHWC")
    prec = lax.Precision.HIGHEST
    x = jnp.transpose(x_nchw, (0, 2, 3, 1)).astype(jnp.float32)

    def bn_relu(v, bn):
        gamma, beta, mean, var = bn
        return jnp.maximum((v - mean) / jnp.sqrt(var + BN_EPS) * gamma + beta, 0.0)

    w1 = jnp.transpose(params["w1"], (2, 3, 1, 0))
    y1 = bn_relu(lax.conv_general_dilated(x, w1, (1, 1), "VALID",
                                          dimension_numbers=dn, precision=prec),
                 params["bn1"])

    wt = jnp.transpose(params["wt"][:, :, ::-1, ::-1], (2, 3, 0, 1))
    lo, hi = k - 1 - p, k - 1 - p + op
    y2 = bn_relu(lax.conv_general_dilated(y1, wt, (1, 1), [(lo, hi), (lo, hi)],
                                          lhs_dilation=(s, s),
                                          dimension_numbers=dn, precision=prec),
                 params["bnt"])

    w2 = jnp.transpose(params["w2"], (2, 3, 1, 0))
    y3 = bn_relu(lax.conv_general_dilated(y2, w2, (1, 1), "VALID",
                                          dimension_numbers=dn, precision=prec),
                 params["bn2"])
    return jnp.transpose(y3, (0, 3, 1, 2))


# -----------------------------------------------------------------------------
# Deterministic parameter init (shapes per Decoder.__init__, bias=False)
# -----------------------------------------------------------------------------
def init_params(key, in_planes, out_planes, k):
    mid = in_planes // 4
    ks = jax.random.split(key, 15)

    def bn(k1, k2, k3, k4, c):
        gamma = 1.0 + 0.1 * jax.random.normal(k1, (c,), jnp.float32)
        beta = 0.1 * jax.random.normal(k2, (c,), jnp.float32)
        mean = 0.1 * jax.random.normal(k3, (c,), jnp.float32)
        var = 1.0 + 0.1 * jnp.abs(jax.random.normal(k4, (c,), jnp.float32))
        return (gamma, beta, mean, var)

    return {
        "w1": 0.1 * jax.random.normal(ks[0], (mid, in_planes, 1, 1), jnp.float32),
        "bn1": bn(ks[1], ks[2], ks[3], ks[4], mid),
        "wt": 0.1 * jax.random.normal(ks[5], (mid, mid, k, k), jnp.float32),
        "bnt": bn(ks[6], ks[7], ks[8], ks[9], mid),
        "w2": 0.1 * jax.random.normal(ks[10], (out_planes, mid, 1, 1), jnp.float32),
        "bn2": bn(ks[11], ks[12], ks[13], ks[14], out_planes),
    }


if __name__ == "__main__":
    # TODO(synk): training-mode BatchNorm (batch-stat computation / running-stat
    # updates) is not implemented; kernel uses standard eval-mode folded BN.
    in_planes, out_planes = 16, 8
    k, s, p, op = 3, 2, 1, 1            # classic LinkNet decoder settings
    B, H, W = 2, 16, 16

    key = jax.random.PRNGKey(0)
    kx, kp = jax.random.split(key)
    x = jax.random.normal(kx, (B, in_planes, H, W), jnp.float32)   # NCHW like PyTorch
    params = init_params(kp, in_planes, out_planes, k)

    out = decoder_forward(params, x, k, s, p, op)
    out = jax.block_until_ready(out)

    Hout = (H - 1) * s - 2 * p + k + op
    assert out.shape == (B, out_planes, Hout, Hout), out.shape

    ref = decoder_reference(params, x, k, s, p, op)
    np.testing.assert_allclose(np.asarray(out), np.asarray(ref),
                               rtol=1e-4, atol=1e-4)
    print("KERNEL_OK")
</pallas_src>

<mosaic_0001>
module attributes {stable_mosaic.version = 11 : i64} {
  func.func @decoder_kernel(%arg0: i32, %arg1: memref<1x16x256xf32, #tpu.memory_space<vmem>>, %arg2: memref<8x16xf32, #tpu.memory_space<vmem>>, %arg3: memref<8x1xf32, #tpu.memory_space<vmem>>, %arg4: memref<9x8x8xf32, #tpu.memory_space<vmem>>, %arg5: memref<8x1xf32, #tpu.memory_space<vmem>>, %arg6: memref<8x8xf32, #tpu.memory_space<vmem>>, %arg7: memref<8x1xf32, #tpu.memory_space<vmem>>, %arg8: memref<4x1x256xf32, #tpu.memory_space<vmem>>, %arg9: memref<1x8x1024xf32, #tpu.memory_space<vmem>>) attributes {dimension_semantics = [#tpu.dimension_semantics<parallel>], iteration_bounds = array<i64: 2>, scalar_prefetch = 0 : i64, scratch_operands = 0 : i64, tpu.core_type = #tpu.core_type<tc>, window_params = [{transform_indices = @transform_0, window_bounds = array<i64: 1, 16, 256>}, {pipeline_mode = #tpu.pipeline_mode<synchronous>, transform_indices = @transform_1, window_bounds = array<i64: 8, 16>}, {pipeline_mode = #tpu.pipeline_mode<synchronous>, transform_indices = @transform_2, window_bounds = array<i64: 8, 1>}, {pipeline_mode = #tpu.pipeline_mode<synchronous>, transform_indices = @transform_3, window_bounds = array<i64: 9, 8, 8>}, {pipeline_mode = #tpu.pipeline_mode<synchronous>, transform_indices = @transform_4, window_bounds = array<i64: 8, 1>}, {pipeline_mode = #tpu.pipeline_mode<synchronous>, transform_indices = @transform_5, window_bounds = array<i64: 8, 8>}, {pipeline_mode = #tpu.pipeline_mode<synchronous>, transform_indices = @transform_6, window_bounds = array<i64: 8, 1>}, {pipeline_mode = #tpu.pipeline_mode<synchronous>, transform_indices = @transform_7, window_bounds = array<i64: 4, 1, 256>}, {transform_indices = @transform_8, window_bounds = array<i64: 1, 8, 1024>}]} {
    %c0 = arith.constant 0 : index
    %c0_0 = arith.constant 0 : index
    %0 = vector.load %arg2[%c0, %c0_0] : memref<8x16xf32, #tpu.memory_space<vmem>>, vector<8x16xf32>
    %c0_1 = arith.constant 0 : index
    %c0_2 = arith.constant 0 : index
    %c0_3 = arith.constant 0 : index
    %1 = vector.load %arg1[%c0_1, %c0_2, %c0_3] : memref<1x16x256xf32, #tpu.memory_space<vmem>>, vector<1x16x256xf32>
    %2 = vector.shape_cast %1 : vector<1x16x256xf32> to vector<16x256xf32>
    %cst = arith.constant dense<0.000000e+00> : vector<8x256xf32>
    %3 = tpu.matmul %0, %2, %cst {dimension_numbers = #tpu.dot_dimension_numbers<[1], [0], [0], [1], [0, 0, 1, 1], [], []>} : vector<8x16xf32>, vector<16x256xf32>, vector<8x256xf32> -> vector<8x256xf32>
    %c0_4 = arith.constant 0 : index
    %c0_5 = arith.constant 0 : index
    %4 = vector.load %arg3[%c0_4, %c0_5] : memref<8x1xf32, #tpu.memory_space<vmem>>, vector<8x1xf32>
    %5 = vector.broadcast %4 : vector<8x1xf32> to vector<8x256xf32>
    %6 = arith.addf %3, %5 : vector<8x256xf32>
    %cst_6 = arith.constant 0.000000e+00 : f32
    %7 = vector.broadcast %cst_6 : f32 to vector<8x256xf32>
    %8 = arith.maximumf %6, %7 : vector<8x256xf32>
    %c4 = arith.constant 4 : index
    %c0_7 = arith.constant 0 : index
    %c0_8 = arith.constant 0 : index
    %9 = vector.load %arg4[%c4, %c0_7, %c0_8] : memref<9x8x8xf32, #tpu.memory_space<vmem>>, vector<1x8x8xf32>
    %10 = vector.shape_cast %9 : vector<1x8x8xf32> to vector<8x8xf32>
    %cst_9 = arith.constant dense<0.000000e+00> : vector<8x256xf32>
    %11 = tpu.matmul %10, %8, %cst_9 {dimension_numbers = #tpu.dot_dimension_numbers<[1], [0], [0], [1], [0, 0, 1, 1], [], []>} : vector<8x8xf32>, vector<8x256xf32>, vector<8x256xf32> -> vector<8x256xf32>
    %c5 = arith.constant 5 : index
    %c0_10 = arith.constant 0 : index
    %c0_11 = arith.constant 0 : index
    %12 = vector.load %arg4[%c5, %c0_10, %c0_11] : memref<9x8x8xf32, #tpu.memory_space<vmem>>, vector<1x8x8xf32>
    %13 = vector.shape_cast %12 : vector<1x8x8xf32> to vector<8x8xf32>
    %cst_12 = arith.constant dense<0.000000e+00> : vector<8x256xf32>
    %14 = tpu.matmul %13, %8, %cst_12 {dimension_numbers = #tpu.dot_dimension_numbers<[1], [0], [0], [1], [0, 0, 1, 1], [], []>} : vector<8x8xf32>, vector<8x256xf32>, vector<8x256xf32> -> vector<8x256xf32>
    %c7 = arith.constant 7 : index
    %c0_13 = arith.constant 0 : index
    %c0_14 = arith.constant 0 : index
    %15 = vector.load %arg4[%c7, %c0_13, %c0_14] : memref<9x8x8xf32, #tpu.memory_space<vmem>>, vector<1x8x8xf32>
    %16 = vector.shape_cast %15 : vector<1x8x8xf32> to vector<8x8xf32>
    %cst_15 = arith.constant dense<0.000000e+00> : vector<8x256xf32>
    %17 = tpu.matmul %16, %8, %cst_15 {dimension_numbers = #tpu.dot_dimension_numbers<[1], [0], [0], [1], [0, 0, 1, 1], [], []>} : vector<8x8xf32>, vector<8x256xf32>, vector<8x256xf32> -> vector<8x256xf32>
    %c8 = arith.constant 8 : index
    %c0_16 = arith.constant 0 : index
    %c0_17 = arith.constant 0 : index
    %18 = vector.load %arg4[%c8, %c0_16, %c0_17] : memref<9x8x8xf32, #tpu.memory_space<vmem>>, vector<1x8x8xf32>
    %19 = vector.shape_cast %18 : vector<1x8x8xf32> to vector<8x8xf32>
    %cst_18 = arith.constant dense<0.000000e+00> : vector<8x256xf32>
    %20 = tpu.matmul %19, %8, %cst_18 {dimension_numbers = #tpu.dot_dimension_numbers<[1], [0], [0], [1], [0, 0, 1, 1], [], []>} : vector<8x8xf32>, vector<8x256xf32>, vector<8x256xf32> -> vector<8x256xf32>
    %21 = vector.extract_strided_slice %8 {offsets = [0, 1], sizes = [8, 255], strides = [1, 1]} : vector<8x256xf32> to vector<8x255xf32>
    %22 = vector.extract_strided_slice %8 {offsets = [0, 0], sizes = [8, 1], strides = [1, 1]} : vector<8x256xf32> to vector<8x1xf32>
    %23 = tpu.concatenate %21, %22 in 1 : vector<8x255xf32>, vector<8x1xf32> -> vector<8x256xf32>
    %c1 = arith.constant 1 : index
    %c0_19 = arith.constant 0 : index
    %c0_20 = arith.constant 0 : index
    %24 = vector.load %arg8[%c1, %c0_19, %c0_20] : memref<4x1x256xf32, #tpu.memory_space<vmem>>, vector<1x1x256xf32>
    %25 = vector.shape_cast %24 : vector<1x1x256xf32> to vector<1x256xf32>
    %26 = vector.broadcast %25 : vector<1x256xf32> to vector<8x256xf32>
    %27 = arith.mulf %23, %26 : vector<8x256xf32>
    %c3 = arith.constant 3 : index
    %c0_21 = arith.constant 0 : index
    %c0_22 = arith.constant 0 : index
    %28 = vector.load %arg4[%c3, %c0_21, %c0_22] : memref<9x8x8xf32, #tpu.memory_space<vmem>>, vector<1x8x8xf32>
    %29 = vector.shape_cast %28 : vector<1x8x8xf32> to vector<8x8xf32>
    %cst_23 = arith.constant dense<0.000000e+00> : vector<8x256xf32>
    %30 = tpu.matmul %29, %27, %cst_23 {dimension_numbers = #tpu.dot_dimension_numbers<[1], [0], [0], [1], [0, 0, 1, 1], [], []>} : vector<8x8xf32>, vector<8x256xf32>, vector<8x256xf32> -> vector<8x256xf32>
    %31 = arith.addf %14, %30 : vector<8x256xf32>
    %c6 = arith.constant 6 : index
    %c0_24 = arith.constant 0 : index
    %c0_25 = arith.constant 0 : index
    %32 = vector.load %arg4[%c6, %c0_24, %c0_25] : memref<9x8x8xf32, #tpu.memory_space<vmem>>, vector<1x8x8xf32>
    %33 = vector.shape_cast %32 : vector<1x8x8xf32> to vector<8x8xf32>
    %cst_26 = arith.constant dense<0.000000e+00> : vector<8x256xf32>
    %34 = tpu.matmul %33, %27, %cst_26 {dimension_numbers = #tpu.dot_dimension_numbers<[1], [0], [0], [1], [0, 0, 1, 1], [], []>} : vector<8x8xf32>, vector<8x256xf32>, vector<8x256xf32> -> vector<8x256xf32>
    %35 = arith.addf %20, %34 : vector<8x256xf32>
    %36 = vector.extract_strided_slice %8 {offsets = [0, 16], sizes = [8, 240], strides = [1, 1]} : vector<8x256xf32> to vector<8x240xf32>
    %37 = vector.extract_strided_slice %8 {offsets = [0, 0], sizes = [8, 16], strides = [1, 1]} : vector<8x256xf32> to vector<8x16xf32>
    %38 = tpu.concatenate %36, %37 in 1 : vector<8x240xf32>, vector<8x16xf32> -> vector<8x256xf32>
    %c2 = arith.constant 2 : index
    %c0_27 = arith.constant 0 : index
    %c0_28 = arith.constant 0 : index
    %39 = vector.load %arg8[%c2, %c0_27, %c0_28] : memref<4x1x256xf32, #tpu.memory_space<vmem>>, vector<1x1x256xf32>
    %40 = vector.shape_cast %39 : vector<1x1x256xf32> to vector<1x256xf32>
    %41 = vector.broadcast %40 : vector<1x256xf32> to vector<8x256xf32>
    %42 = arith.mulf %38, %41 : vector<8x256xf32>
    %c1_29 = arith.constant 1 : index
    %c0_30 = arith.constant 0 : index
    %c0_31 = arith.constant 0 : index
    %43 = vector.load %arg4[%c1_29, %c0_30, %c0_31] : memref<9x8x8xf32, #tpu.memory_space<vmem>>, vector<1x8x8xf32>
    %44 = vector.shape_cast %43 : vector<1x8x8xf32> to vector<8x8xf32>
    %cst_32 = arith.constant dense<0.000000e+00> : vector<8x256xf32>
    %45 = tpu.matmul %44, %42, %cst_32 {dimension_numbers = #tpu.dot_dimension_numbers<[1], [0], [0], [1], [0, 0, 1, 1], [], []>} : vector<8x8xf32>, vector<8x256xf32>, vector<8x256xf32> -> vector<8x256xf32>
    %46 = arith.addf %17, %45 : vector<8x256xf32>
    %c2_33 = arith.constant 2 : index
    %c0_34 = arith.constant 0 : index
    %c0_35 = arith.constant 0 : index
    %47 = vector.load %arg4[%c2_33, %c0_34, %c0_35] : memref<9x8x8xf32, #tpu.memory_space<vmem>>, vector<1x8x8xf32>
    %48 = vector.shape_cast %47 : vector<1x8x8xf32> to vector<8x8xf32>
    %cst_36 = arith.constant dense<0.000000e+00> : vector<8x256xf32>
    %49 = tpu.matmul %48, %42, %cst_36 {dimension_numbers = #tpu.dot_dimension_numbers<[1], [0], [0], [1], [0, 0, 1, 1], [], []>} : vector<8x8xf32>, vector<8x256xf32>, vector<8x256xf32> -> vector<8x256xf32>
    %50 = arith.addf %35, %49 : vector<8x256xf32>
    %51 = vector.extract_strided_slice %8 {offsets = [0, 17], sizes = [8, 239], strides = [1, 1]} : vector<8x256xf32> to vector<8x239xf32>
    %52 = vector.extract_strided_slice %8 {offsets = [0, 0], sizes = [8, 17], strides = [1, 1]} : vector<8x256xf32> to vector<8x17xf32>
    %53 = tpu.concatenate %51, %52 in 1 : vector<8x239xf32>, vector<8x17xf32> -> vector<8x256xf32>
    %c3_37 = arith.constant 3 : index
    %c0_38 = arith.constant 0 : index
    %c0_39 = arith.constant 0 : index
    %54 = vector.load %arg8[%c3_37, %c0_38, %c0_39] : memref<4x1x256xf32, #tpu.memory_space<vmem>>, vector<1x1x256xf32>
    %55 = vector.shape_cast %54 : vector<1x1x256xf32> to vector<1x256xf32>
    %56 = vector.broadcast %55 : vector<1x256xf32> to vector<8x256xf32>
    %57 = arith.mulf %53, %56 : vector<8x256xf32>
    %c0_40 = arith.constant 0 : index
    %c0_41 = arith.constant 0 : index
    %c0_42 = arith.constant 0 : index
    %58 = vector.load %arg4[%c0_40, %c0_41, %c0_42] : memref<9x8x8xf32, #tpu.memory_space<vmem>>, vector<1x8x8xf32>
    %59 = vector.shape_cast %58 : vector<1x8x8xf32> to vector<8x8xf32>
    %cst_43 = arith.constant dense<0.000000e+00> : vector<8x256xf32>
    %60 = tpu.matmul %59, %57, %cst_43 {dimension_numbers = #tpu.dot_dimension_numbers<[1], [0], [0], [1], [0, 0, 1, 1], [], []>} : vector<8x8xf32>, vector<8x256xf32>, vector<8x256xf32> -> vector<8x256xf32>
    %61 = arith.addf %50, %60 : vector<8x256xf32>
    %62 = tpu.concatenate %11, %31, %46, %61 in 1 : vector<8x256xf32>, vector<8x256xf32>, vector<8x256xf32>, vector<8x256xf32> -> vector<8x1024xf32>
    %c0_44 = arith.constant 0 : index
    %c0_45 = arith.constant 0 : index
    %63 = vector.load %arg5[%c0_44, %c0_45] : memref<8x1xf32, #tpu.memory_space<vmem>>, vector<8x1xf32>
    %64 = vector.broadcast %63 : vector<8x1xf32> to vector<8x1024xf32>
    %65 = arith.addf %62, %64 : vector<8x1024xf32>
    %cst_46 = arith.constant 0.000000e+00 : f32
    %66 = vector.broadcast %cst_46 : f32 to vector<8x1024xf32>
    %67 = arith.maximumf %65, %66 : vector<8x1024xf32>
    %c0_47 = arith.constant 0 : index
    %c0_48 = arith.constant 0 : index
    %68 = vector.load %arg6[%c0_47, %c0_48] : memref<8x8xf32, #tpu.memory_space<vmem>>, vector<8x8xf32>
    %cst_49 = arith.constant dense<0.000000e+00> : vector<8x1024xf32>
    %69 = tpu.matmul %68, %67, %cst_49 {dimension_numbers = #tpu.dot_dimension_numbers<[1], [0], [0], [1], [0, 0, 1, 1], [], []>} : vector<8x8xf32>, vector<8x1024xf32>, vector<8x1024xf32> -> vector<8x1024xf32>
    %c0_50 = arith.constant 0 : index
    %c0_51 = arith.constant 0 : index
    %70 = vector.load %arg7[%c0_50, %c0_51] : memref<8x1xf32, #tpu.memory_space<vmem>>, vector<8x1xf32>
    %71 = vector.broadcast %70 : vector<8x1xf32> to vector<8x1024xf32>
    %72 = arith.addf %69, %71 : vector<8x1024xf32>
    %cst_52 = arith.constant 0.000000e+00 : f32
    %73 = vector.broadcast %cst_52 : f32 to vector<8x1024xf32>
    %74 = arith.maximumf %72, %73 : vector<8x1024xf32>
    %c0_53 = arith.constant 0 : index
    %c0_54 = arith.constant 0 : index
    %c0_55 = arith.constant 0 : index
    %75 = vector.load %arg9[%c0_53, %c0_54, %c0_55] : memref<1x8x1024xf32, #tpu.memory_space<vmem>>, vector<1x8x1024xf32>
    %76 = vector.shape_cast %75 : vector<1x8x1024xf32> to vector<8x1024xf32>
    %77 = vector.shape_cast %74 : vector<8x1024xf32> to vector<1x8x1024xf32>
    tpu.vector_store %arg9[%c0_53, %c0_54, %c0_55], %77 {strides = array<i32>} : memref<1x8x1024xf32, #tpu.memory_space<vmem>>, vector<1x8x1024xf32>,
    return
  }
  func.func @transform_0(%arg0: i32) -> (i32, i32, i32) {
    %c0_i32 = arith.constant 0 : i32
    %c0_i32_0 = arith.constant 0 : i32
    %c0_i32_1 = arith.constant 0 : i32
    return %arg0, %c0_i32, %c0_i32_0 : i32, i32, i32
  }
  func.func @transform_1(%arg0: i32) -> (i32, i32) {
    %c0_i32 = arith.constant 0 : i32
    %c0_i32_0 = arith.constant 0 : i32
    %c0_i32_1 = arith.constant 0 : i32
    return %c0_i32, %c0_i32_0 : i32, i32
  }
  func.func @transform_2(%arg0: i32) -> (i32, i32) {
    %c0_i32 = arith.constant 0 : i32
    %c0_i32_0 = arith.constant 0 : i32
    %c0_i32_1 = arith.constant 0 : i32
    return %c0_i32, %c0_i32_0 : i32, i32
  }
  func.func @transform_3(%arg0: i32) -> (i32, i32, i32) {
    %c0_i32 = arith.constant 0 : i32
    %c0_i32_0 = arith.constant 0 : i32
    %c0_i32_1 = arith.constant 0 : i32
    %c0_i32_2 = arith.constant 0 : i32
    return %c0_i32, %c0_i32_0, %c0_i32_1 : i32, i32, i32
  }
  func.func @transform_4(%arg0: i32) -> (i32, i32) {
    %c0_i32 = arith.constant 0 : i32
    %c0_i32_0 = arith.constant 0 : i32
    %c0_i32_1 = arith.constant 0 : i32
    return %c0_i32, %c0_i32_0 : i32, i32
  }
  func.func @transform_5(%arg0: i32) -> (i32, i32) {
    %c0_i32 = arith.constant 0 : i32
    %c0_i32_0 = arith.constant 0 : i32
    %c0_i32_1 = arith.constant 0 : i32
    return %c0_i32, %c0_i32_0 : i32, i32
  }
  func.func @transform_6(%arg0: i32) -> (i32, i32) {
    %c0_i32 = arith.constant 0 : i32
    %c0_i32_0 = arith.constant 0 : i32
    %c0_i32_1 = arith.constant 0 : i32
    return %c0_i32, %c0_i32_0 : i32, i32
  }
  func.func @transform_7(%arg0: i32) -> (i32, i32, i32) {
    %c0_i32 = arith.constant 0 : i32
    %c0_i32_0 = arith.constant 0 : i32
    %c0_i32_1 = arith.constant 0 : i32
    %c0_i32_2 = arith.constant 0 : i32
    return %c0_i32, %c0_i32_0, %c0_i32_1 : i32, i32, i32
  }
  func.func @transform_8(%arg0: i32) -> (i32, i32, i32) {
    %c0_i32 = arith.constant 0 : i32
    %c0_i32_0 = arith.constant 0 : i32
    %c0_i32_1 = arith.constant 0 : i32
    return %arg0, %c0_i32, %c0_i32_0 : i32, i32, i32
  }
}

</mosaic_0001>

<bundles_post_ra>
// kernel: tpu_custom_call.1
= control target key start
LH: loop header
LB: loop body
LE: loop exit
PB: predicated region body
PF: predicated region fallthrough
CT: control target
= control target key end

     0   :  { %13 = vsyncpa [#allocation3], 0  ;;  %s1502_s0 = inlined_call_operand.vmem [shape: f32[2,16,256], index: 0, kind: input, shape index: {}]   ;;  %s1503_s1 = inlined_call_operand.vmem [shape: f32[8,16], index: 1, kind: input, shape index: {}]   ;;  %s1504_s2 = inlined_call_operand.vmem [shape: f32[8,1], index: 2, kind: input, shape index: {}]   ;;  %s1505_s3 = inlined_call_operand.vmem [shape: f32[9,8,8], index: 3, kind: input, shape index: {}]   ;;  %s1506_s4 = inlined_call_operand.vmem [shape: f32[8,1], index: 4, kind: input, shape index: {}]   ;;  %s1507_s5 = inlined_call_operand.vmem [shape: f32[8,8], index: 5, kind: input, shape index: {}]   ;;  %s1508_s6 = inlined_call_operand.vmem [shape: f32[8,1], index: 6, kind: input, shape index: {}]   ;;  %s1509_s7 = inlined_call_operand.vmem [shape: f32[4,1,256], index: 7, kind: input, shape index: {}]   ;;  %s1510_s8 = inlined_call_operand.hbm [shape: f32[2,8,1024], index: 8, kind: output, shape index: {}]  }
   0x1   :  { %15 = vsyncpa [#allocation3 + $0x1], 0  ;;  %s1325_s27 = smov 0   ;;  %s1327_s28 = smov 0  }
   0x2   :  { %s1329_s29 = smov 0   ;;  %s1331_s30 = smov 0  }
   0x3 LB: > { %s1346_s9 = sadd.s32 4294967295, %s1274_s30   ;;  %s1113_s10 = sadd.s32 4294967294, %s1274_s30   ;;  %s1274_s30 = sphi %s1331_s30, %s1516_s30   ;;  %s1270_s29 = sphi %s1329_s29, %s1515_s29   ;;  %s1266_s28 = sphi %s1327_s28, %s1514_s28   ;;  %s1262_s27 = sphi %s1325_s27, %s1513_s27  }
   0x4   : > { %s1350_s11 = sadd.s32 1, %s1274_s30   ;;  %s201_s12 = sadd.s32 1, %s1270_s29 }
   0x5   : > { %s198_s13 = ssub.s32 %s1274_s30, %s1350_s11  ;;  %p211_p0 = scmp.ne.s32.totalorder %s1270_s29, %s1266_s28 }
   0x6   : > { %p199_p1 = scmp.eq.s32.totalorder %s198_s13, 0  ;;  %p212_p2 = scmp.eq.s32.totalorder %s1346_s9, 1 }
   0x7   : > { %p217_p3 = scmp.ne.s32.totalorder %s1266_s28, %s1262_s27  ;;  %p218_p4 = scmp.eq.s32.totalorder %s1113_s10, 1 }
   0x8   : > { %s1361_s14 = scalar_select %p199_p1, %s1270_s29, %s201_s12  }
   0x9   : > { %p1363_p5 = por %p212_p2, %p211_p0  ;;  %p1367_p6 = por %p218_p4, %p217_p3 }
   0xa   : > { %p1116_p7 = scmp.ge.s32.totalorder %s1274_s30, 1  ;;  %p265_p8 = scmp.lt.s32.totalorder %s1274_s30, 3 }
   0xc   : > { %p266_p9 = pnand %p1116_p7, %p265_p8 }
   0xd   : > { %p299_p10 = scmp.lt.s32.totalorder (!%p266_p9), %s1346_s9, 1  ;;  %s1277_s26 = smov (!%p266_p9), 112  }
   0xe   : > { %269 = sbr.rel (%p266_p9) target bundleno = 577 (0x241), region = 52  ;;  %s1278_s10 = smov (!%p266_p9), 127  }
   0xf   : > { %s1279_s17 = smov (!%p266_p9), 111  }
  0x13   : > { %v309_v0 = vld [vmem:[%s1504_s2] sm:$0xff]  ;;  %v1276_v1 = vmov 0   ;;  %s300_s19 = scalar_select %p299_p10, %s1346_s9, 1  ;;  %vm315_vm0 = vcmask 130048   ;;  %vm363_vm1 = vcmask 64512   ;;  %v1125_v14 = vld [vmem:[%s1505_s3 + $0x28] sm:$0xff] }
  0x14   : > { %1209 = vset.pattern.permute.xlu0 %v1276_v1  ;;  %1210 = vset.pattern.permute.xlu1 %v1276_v1  ;;  %v304_v6 = vld [vmem:[%s1503_s1] sm:$0xff]  ;;  %v1126_v18 = vld [vmem:[%s1505_s3 + $0x38] sm:$0xff]  ;;  %vm419_vm2 = vcmask 1039360   ;;  %vm614_vm3 = vcmask 916480   ;;  %vm768_vm4 = vcmask 908288   ;;  %v1134_v47 = vld [vmem:[%s1505_s3 + $0x30] sm:$0xff] }
  0x15   : > { %312 = vperm.xlu0 %1209, %v309_v0   ;;  %1211 = vset.pattern.permute.xlu2 %v1276_v1  ;;  %s1164_s20 = sshll.u32 %s300_s19, 5  ;;  %v1122_v15 = vld [vmem:[%s1505_s3 + $0x20] sm:$0xff]  ;;  %v1129_v30 = vld [vmem:[%s1505_s3 + $0x18] sm:$0xff]  ;;  %v1140_v49 = vld [vmem:[%s1505_s3 + $0x8] sm:$0xff] }
  0x16   : > { %s303_s23 = scalar_lea.vmem %s1502_s0, %s1164_s20  ;;  %v1127_v16 = vld [vmem:[%s1505_s3 + $0x40] sm:$0xff]  ;;  %v1145_v50 = vld [vmem:[%s1505_s3 + $0x10] sm:$0xff]  ;;  %s296_s20 = sand.u32 1, %s1266_s28  }
  0x17   : > { %v307_v2 = vld [vmem:[%s303_s23 + $0x10] sm:$0xff]  ;;  %v308_v3 = vld [vmem:[%s303_s23 + $0x18] sm:$0xff]  ;;  %v305_v4 = vld [vmem:[%s303_s23] sm:$0xff]  ;;  %s1117_s21 = sshll.u32 %s296_s20, 6  ;;  %s1038_s12 = scalar_lea.sflag [#allocation3], %s296_s20 }
  0x18   : > { %333 = vmatpush.msra.mxu0 %v307_v2  ;;  %353 = vmatpush.msra.mxu1 %v308_v3  ;;  %v306_v5 = vld [vmem:[%s303_s23 + $0x8] sm:$0xff]  ;;  %v829_v17 = vld [vmem:[%s1506_s4] sm:$0xff]  ;;  %s1458_s22 = scalar_lea.vmem [#allocation2], %s1117_s21  ;;  %s1165_s23 = sshll.u32 %s1346_s9, 6 }
  0x19   : > { %v1128_v19 = vld [vmem:[%s1509_s7 + $0x2] sm:$0x3]  ;;  %v1139_v27 = vld [vmem:[%s1509_s7 + $0x4] sm:$0x3]  ;;  %v1148_v31 = vld [vmem:[%s1509_s7 + $0x6] sm:$0x3] }
  0x1a   : > { %334 = vmatpush.msra.mxu0 %v305_v4  ;;  %354 = vmatpush.msra.mxu1 %v306_v5  ;;  %v428_v22 = vperm.slane %v1128_v19, 0  ;;  %v429_v23 = vperm.slane %v1128_v19, 1  ;;  %v623_v32 = vperm.slane %v1139_v27, 0  ;;  %v624_v33 = vperm.slane %v1139_v27, 1  ;;  %v783_v48 = vld [vmem:[%s1505_s3] sm:$0xff]  ;;  %s1051_s9 = sshll.u32 %s1458_s22, 4  ;;  %s1052_s9 = int_to_ptr.vmem [resolvable:$true] %s1051_s9 }
  0x1b   : > { %1120 = vmatmul.msk.f32.vlgmr.msra.gmra.mxu0 %vm315_vm0, %v304_v6  ;;  %1121 = vmatmul.msk.f32.vlgmr.msra.gmra.mxu1 %vm315_vm0, %v304_v6  ;;  %v777_v35 = vperm.slane %v1148_v31, 0  ;;  %v778_v36 = vperm.slane %v1148_v31, 1  ;;  %v851_v58 = vld [vmem:[%s1507_s5] sm:$0xff]  ;;  %s1232_s21 = scalar_lea.hbm %s1510_s8, 128 }
  0x1c   : > { %v852_v1 = vld [vmem:[%s1508_s6] sm:$0xff] }
  0x87   : > { %v313_v7 = vpop.permute.xlu0 %312 }
  0x98   : > { %v336_v8 = vpop.f32.mrf.mxu0  ;;  %v356_v9 = vpop.f32.mrf.mxu1 }
  0x99   : > { %v337_v10 = vadd.f32 %v336_v8, %v313_v7  ;;  %v357_v11 = vadd.f32 %v356_v9, %v313_v7 }
  0x9b   : > { %v359_v12 = vmax.f32 %v337_v10, 0.0  ;;  %v360_v13 = vmax.f32 %v357_v11, 0.0 }
  0x9d   : > { %612 = vrot.lane.b32.xlu2 %v360_v13, %s1277_s26  ;;  %417 = vrot.lane.b32.xlu1 %v360_v13, %s1278_s10 }
  0x9e   : > { %402 = vmatpush.msra.mxu3 %v360_v13  ;;  %517 = vmatpush.msrb.mxu1 %v360_v13 }
  0x9f   : > { %415 = vrot.lane.b32.xlu0 %v359_v12, %s1278_s10  ;;  %382 = vmatpush.msra.mxu2 %v359_v12 }
  0xa0   : > { %497 = vmatpush.msrb.mxu0 %v359_v12  ;;  %605 = vmatpush.msra.mxu1 %v360_v13 }
  0xa1   : > { %1133 = vmatmul.msk.f32.vlgmr.msrb.gmra.mxu1 %vm363_vm1, %v1125_v14  ;;  %1132 = vmatmul.msk.f32.vlgmr.msrb.gmra.mxu0 %vm363_vm1, %v1125_v14 }
  0xa2   : > { %585 = vmatpush.msra.mxu0 %v359_v12  ;;  %712 = vmatpush.msrb.mxu1 %v360_v13 }
  0xa3   : > { %1123 = vmatmul.msk.f32.vlgmr.msra.gmra.mxu2 %vm363_vm1, %v1122_v15  ;;  %1124 = vmatmul.msk.f32.vlgmr.msra.gmra.mxu3 %vm363_vm1, %v1122_v15 }
  0xa4   : > { %692 = vmatpush.msrb.mxu0 %v359_v12 }
  0xa5   : > { %764 = vrot.lane.b32.xlu2 %v359_v12, %s1279_s17  ;;  %610 = vrot.lane.b32.xlu1 %v359_v12, %s1277_s26  ;;  %s1049_s26 = scalar_lea.hbm %s1510_s8, %s1165_s23 }
  0xa6   : > { %s1053_s10 = sshll.u32 %s1049_s26, 4  ;;  %s1054_s10 = int_to_ptr.hbm [resolvable:$true] %s1053_s10 }
  0xa7   : > { %766 = vrot.lane.b32.xlu0 %v360_v13, %s1279_s17  ;;  %s1226_s13 = sshra.s32 %s1054_s10, 4  ;;  %s1227_s13 = int_to_ptr.hbm [resolvable:$true] %s1226_s13 }
  0xa8   : > { %s1228_s17 = scalar_lea.hbm %s1227_s13, 64  ;;  %p1233_p0 = scmp.lt.s32.totalorder %s1227_s13, %s1510_s8 }
  0xa9   : > { %1137 = vmatmul.msk.f32.vlgmr.msra.gmra.mxu0 %vm363_vm1, %v1127_v16  ;;  %1138 = vmatmul.msk.f32.vlgmr.msra.gmra.mxu1 %vm363_vm1, %v1127_v16  ;;  %p1229_p11 = scmp.ne.s32.totalorder %s1227_s13, %s1228_s17  ;;  %p1234_p1 = scmp.lt.s32.totalorder %s1232_s21, %s1228_s17 }
  0xab   : > { %p1230_p12 = pnand %p1229_p11, %p1363_p5  ;;  %p1235_p2 = por %p1234_p1, %p1233_p0 }
  0xad   : > { %832 = vperm.xlu1 %1210, %v829_v17   ;;  %855 = vperm.xlu2 %1211, %v852_v1   ;;  %p1231_p13 = pneg %p1230_p12 }
  0xaf   : > { %p1236_p3 = pnand %p1235_p2, %p1231_p13 }
  0xb1   : > { %1143 = vmatmul.msk.f32.vlgmr.msrb.gmra.mxu0 %vm363_vm1, %v1126_v18  ;;  %1144 = vmatmul.msk.f32.vlgmr.msrb.gmra.mxu1 %vm363_vm1, %v1126_v18 }
  0xf7   : > { %v613_v20 = vpop.permute.xlu2 %612 }
  0xff   : > { %v765_v39 = vpop.permute.xlu2 %764 }
 0x10f   : > { %v418_v21 = vpop.permute.xlu1 %417 }
 0x111   : > { %v416_v24 = vpop.permute.xlu0 %415 }
 0x112   : > { %v420_v25 = vsel %vm419_vm2, %v416_v24, %v418_v21  ;;  %v424_v26 = vsel %vm419_vm2, %v418_v21, %v416_v24 }
 0x113   : > { %v432_v28 = vmul.f32 %v428_v22, %v420_v25  ;;  %v433_v29 = vmul.f32 %v429_v23, %v424_v26 }
 0x115   : > { %454 = vmatpush.msrb.mxu2 %v432_v28  ;;  %474 = vmatpush.msrb.mxu3 %v433_v29 }
 0x116   : > { %1130 = vmatmul.msk.f32.vlgmr.msrb.gmra.mxu2 %vm363_vm1, %v1129_v30  ;;  %1131 = vmatmul.msk.f32.vlgmr.msrb.gmra.mxu3 %vm363_vm1, %v1129_v30 }
 0x117   : > { %542 = vmatpush.msra.mxu2 %v432_v28  ;;  %562 = vmatpush.msra.mxu3 %v433_v29  ;;  %v611_v34 = vpop.permute.xlu1 %610 }
 0x118   : > { %v615_v37 = vsel %vm614_vm3, %v611_v34, %v613_v20  ;;  %v619_v38 = vsel %vm614_vm3, %v613_v20, %v611_v34  ;;  %v856_v34 = vpop.permute.xlu2 %855 }
 0x119   : > { %v627_v40 = vmul.f32 %v623_v32, %v615_v37  ;;  %v628_v41 = vmul.f32 %v624_v33, %v619_v38  ;;  %v767_v42 = vpop.permute.xlu0 %766 }
 0x11a   : > { %v769_v43 = vsel %vm768_vm4, %v765_v39, %v767_v42  ;;  %v773_v44 = vsel %vm768_vm4, %v767_v42, %v765_v39 }
 0x11b   : > { %v781_v45 = vmul.f32 %v777_v35, %v769_v43  ;;  %v782_v46 = vmul.f32 %v778_v36, %v773_v44  ;;  %649 = vmatpush.msrb.mxu2 %v627_v40  ;;  %669 = vmatpush.msrb.mxu3 %v628_v41 }
 0x11d   : > { %802 = vmatpush.msra.mxu0 %v781_v45  ;;  %822 = vmatpush.msra.mxu1 %v782_v46 }
 0x11e   : > { %1135 = vmatmul.msk.f32.vlgmr.msra.gmra.mxu2 %vm363_vm1, %v1134_v47  ;;  %1136 = vmatmul.msk.f32.vlgmr.msra.gmra.mxu3 %vm363_vm1, %v1134_v47  ;;  %v499_v59 = vpop.f32.mrf.mxu0  ;;  %v519_v60 = vpop.f32.mrf.mxu1 }
 0x11f   : > { %737 = vmatpush.msra.mxu2 %v627_v40  ;;  %757 = vmatpush.msra.mxu3 %v628_v41  ;;  %v833_v53 = vpop.permute.xlu1 %832 }
 0x120   : > { %1149 = vmatmul.msk.f32.vlgmr.msra.gmra.mxu0 %vm363_vm1, %v783_v48  ;;  %1150 = vmatmul.msk.f32.vlgmr.msra.gmra.mxu1 %vm363_vm1, %v783_v48 }
 0x126   : > { %1141 = vmatmul.msk.f32.vlgmr.msrb.gmra.mxu2 %vm363_vm1, %v1140_v49  ;;  %1142 = vmatmul.msk.f32.vlgmr.msrb.gmra.mxu3 %vm363_vm1, %v1140_v49  ;;  %v404_v51 = vpop.f32.mrf.mxu3  ;;  %v384_v52 = vpop.f32.mrf.mxu2 }
 0x127   : > { %v835_v54 = vadd.f32 %v833_v53, %v384_v52  ;;  %v836_v55 = vadd.f32 %v833_v53, %v404_v51  ;;  %v587_v4 = vpop.f32.mrf.mxu0  ;;  %v607_v5 = vpop.f32.mrf.mxu1 }
 0x129   : > { %v843_v56 = vmax.f32 %v835_v54, 0.0  ;;  %v844_v57 = vmax.f32 %v836_v55, 0.0 }
 0x12b   : > { %876 = vmatpush.msrb.mxu2 %v843_v56  ;;  %896 = vmatpush.msrb.mxu3 %v844_v57 }
 0x12e   : > { %1146 = vmatmul.msk.f32.vlgmr.msra.gmra.mxu2 %vm363_vm1, %v1145_v50  ;;  %1147 = vmatmul.msk.f32.vlgmr.msra.gmra.mxu3 %vm363_vm1, %v1145_v50 }
 0x12f   : > { %v694_v10 = vpop.f32.mrf.mxu0  ;;  %v714_v11 = vpop.f32.mrf.mxu1 }
 0x136   : > { %1151 = vmatmul.msk.f32.vlgmr.msrb.gmra.mxu2 %vm363_vm1, %v851_v58  ;;  %1152 = vmatmul.msk.f32.vlgmr.msrb.gmra.mxu3 %vm363_vm1, %v851_v58 }
 0x199   : > { %v456_v61 = vpop.f32.mrf.mxu2  ;;  %v476_v62 = vpop.f32.mrf.mxu3 }
 0x19a   : > { %v500_v63 = vadd.f32 %v499_v59, %v456_v61  ;;  %v520_v0 = vadd.f32 %v519_v60, %v476_v62 }
 0x19c   : > { %v837_v2 = vadd.f32 %v833_v53, %v500_v63  ;;  %v838_v3 = vadd.f32 %v833_v53, %v520_v0 }
 0x19d   : > { %v804_v22 = vpop.f32.mrf.mxu0  ;;  %v824_v23 = vpop.f32.mrf.mxu1 }
 0x19e   : > { %v845_v6 = vmax.f32 %v837_v2, 0.0  ;;  %v846_v7 = vmax.f32 %v838_v3, 0.0 }
 0x1a0   : > { %916 = vmatpush.msrb.mxu0 %v845_v6  ;;  %936 = vmatpush.msrb.mxu1 %v846_v7 }
 0x1a1   : > { %v544_v8 = vpop.f32.mrf.mxu2  ;;  %v564_v9 = vpop.f32.mrf.mxu3  ;;  %1153 = vmatmul.msk.f32.vlgmr.msrb.gmra.mxu0 %vm363_vm1, %v851_v58  ;;  %1154 = vmatmul.msk.f32.vlgmr.msrb.gmra.mxu1 %vm363_vm1, %v851_v58 }
 0x1a2   : > { %v588_v20 = vadd.f32 %v587_v4, %v544_v8  ;;  %v608_v21 = vadd.f32 %v607_v5, %v564_v9 }
 0x1a9   : > { %v651_v12 = vpop.f32.mrf.mxu2  ;;  %v671_v13 = vpop.f32.mrf.mxu3 }
 0x1aa   : > { %v695_v14 = vadd.f32 %v694_v10, %v651_v12  ;;  %v715_v15 = vadd.f32 %v714_v11, %v671_v13 }
 0x1ac   : > { %v839_v16 = vadd.f32 %v833_v53, %v695_v14  ;;  %v840_v17 = vadd.f32 %v833_v53, %v715_v15 }
 0x1ae   : > { %v847_v18 = vmax.f32 %v839_v16, 0.0  ;;  %v848_v19 = vmax.f32 %v840_v17, 0.0 }
 0x1b0   : > { %956 = vmatpush.msra.mxu2 %v847_v18  ;;  %976 = vmatpush.msra.mxu3 %v848_v19 }
 0x1b1   : > { %v739_v24 = vpop.f32.mrf.mxu2  ;;  %v759_v25 = vpop.f32.mrf.mxu3  ;;  %1155 = vmatmul.msk.f32.vlgmr.msra.gmra.mxu2 %vm363_vm1, %v851_v58  ;;  %1156 = vmatmul.msk.f32.vlgmr.msra.gmra.mxu3 %vm363_vm1, %v851_v58 }
 0x1b2   : > { %v762_v26 = vadd.f32 %v739_v24, %v588_v20  ;;  %v763_v27 = vadd.f32 %v759_v25, %v608_v21 }
 0x1b4   : > { %v827_v28 = vadd.f32 %v804_v22, %v762_v26  ;;  %v828_v29 = vadd.f32 %v824_v23, %v763_v27 }
 0x1b6   : > { %v841_v30 = vadd.f32 %v833_v53, %v827_v28  ;;  %v842_v31 = vadd.f32 %v833_v53, %v828_v29 }
 0x1b8   : > { %v849_v32 = vmax.f32 %v841_v30, 0.0  ;;  %v850_v33 = vmax.f32 %v842_v31, 0.0 }
 0x1b9   : > { %v878_v35 = vpop.f32.mrf.mxu2  ;;  %v898_v36 = vpop.f32.mrf.mxu3 }
 0x1ba   : > { %996 = vmatpush.msra.mxu0 %v849_v32  ;;  %1016 = vmatpush.msra.mxu1 %v850_v33  ;;  %v879_v37 = vadd.f32 %v878_v35, %v856_v34  ;;  %v899_v38 = vadd.f32 %v898_v36, %v856_v34 }
 0x1bb   : > { %1157 = vmatmul.msk.f32.vlgmr.msra.gmra.mxu0 %vm363_vm1, %v851_v58  ;;  %1158 = vmatmul.msk.f32.vlgmr.msra.gmra.mxu1 %vm363_vm1, %v851_v58 }
 0x1bc   : > { %v1021_v39 = vmax.f32 %v879_v37, 0.0  ;;  %v1022_v40 = vmax.f32 %v899_v38, 0.0 }
 0x1be   : > { %1029 = vst [vmem:[%s1458_s22] sm:$0xff] %v1021_v39 }
 0x1bf   : > { %1030 = vst [vmem:[%s1458_s22 + $0x8] sm:$0xff] %v1022_v40 }
 0x21e   : > { %v918_v41 = vpop.f32.mrf.mxu0  ;;  %v938_v42 = vpop.f32.mrf.mxu1 }
 0x21f   : > { %v919_v43 = vadd.f32 %v918_v41, %v856_v34  ;;  %v939_v44 = vadd.f32 %v938_v42, %v856_v34 }
 0x221   : > { %v1023_v45 = vmax.f32 %v919_v43, 0.0  ;;  %v1024_v46 = vmax.f32 %v939_v44, 0.0 }
 0x223   : > { %1031 = vst [vmem:[%s1458_s22 + $0x10] sm:$0xff] %v1023_v45 }
 0x224   : > { %1032 = vst [vmem:[%s1458_s22 + $0x18] sm:$0xff] %v1024_v46 }
 0x234   : > { %v958_v47 = vpop.f32.mrf.mxu2  ;;  %v978_v48 = vpop.f32.mrf.mxu3 }
 0x235   : > { %v959_v49 = vadd.f32 %v958_v47, %v856_v34  ;;  %v979_v50 = vadd.f32 %v978_v48, %v856_v34 }
 0x237   : > { %v1025_v51 = vmax.f32 %v959_v49, 0.0  ;;  %v1026_v52 = vmax.f32 %v979_v50, 0.0 }
 0x238   : > { %v998_v53 = vpop.f32.mrf.mxu0  ;;  %v1018_v54 = vpop.f32.mrf.mxu1 }
 0x239   : > { %1033 = vst [vmem:[%s1458_s22 + $0x20] sm:$0xff] %v1025_v51  ;;  %v999_v55 = vadd.f32 %v998_v53, %v856_v34  ;;  %v1019_v56 = vadd.f32 %v1018_v54, %v856_v34 }
 0x23a   : > { %1034 = vst [vmem:[%s1458_s22 + $0x28] sm:$0xff] %v1026_v52 }
 0x23b   : > { %v1027_v57 = vmax.f32 %v999_v55, 0.0  ;;  %v1028_v58 = vmax.f32 %v1019_v56, 0.0 }
 0x23d   : > { %1035 = vst [vmem:[%s1458_s22 + $0x30] sm:$0xff] %v1027_v57 }
 0x23e   : > { %1036 = vst [vmem:[%s1458_s22 + $0x38] sm:$0xff] %v1028_v58 }
 0x23f   : > { %1239 = shalt.err (!%p1236_p3)
}
 0x240   : > { %1166 = dma.vmem_to_hbm [thread:$0]  (%p1363_p5), %s1052_s9, 1024, %s1054_s10, %s1038_s12  }
 0x241 PF: > { %p1172_p4 = scmp.ge.s32.totalorder %s1274_s30, 2  ;;  %s1065_s20 = sand.u32 1, %s1262_s27  }
 0x242   : > { %s1066_s22 = scalar_lea.sflag [#allocation3], %s1065_s20 }
 0x243   : > { %p1169_p7 = pnand %p1172_p4, %p1367_p6 }
 0x245   : > { %p1170_p8 = pneg %p1169_p7 }
 0x247   : > { %1257 = dma.done.wait (%p1170_p8), %s1066_s22, 1024  }
 0x248   : > { %1259 = vsyncadd (%p1170_p8), %s1066_s22, 4294966272  ;;  %p18_p9 = scmp.ge.s32.totalorder %s1350_s11, 4   ;;  %s1513_s27 = smov %s1266_s28 }
 0x249   : > { %s1514_s28 = smov %s1270_s29  ;;  %s1515_s29 = smov %s1361_s14 }
 0x24a   : > { %s1516_s30 = smov %s1350_s11  ;;  %20 = sbr.rel (!%p18_p9) target bundleno = 3 (0x3), region = 98 }
 0x24f   :  { %1072 = vsyncpa [#allocation3], 1 }
 0x250   :  { %1074 = vsyncpa [#allocation3 + $0x1], 1 }

</bundles_post_ra>
